<compile_context>
chip_gen: v7x
topology: tpu7x:2x2x1
jax: 0.10.0
libtpu: 0.0.40
codegen_flags: <defaults>
</compile_context>

<pallas_src>
import functools

import jax
import jax.numpy as jnp
from jax.experimental import pallas as pl
from jax.experimental.pallas import tpu as pltpu

LN_EPS = 1e-5  # torch.nn.LayerNorm default
_MIB = 1024 * 1024


# ---------------------------------------------------------------------------
# Kernels
# ---------------------------------------------------------------------------
def ffn_fused_kernel(x_ref, gamma_ref, beta_ref, w1_ref, b1_ref, w2_ref,
                     b2_ref, o_ref):
    """Whole FFN on a (tm, D) row tile; W1/W2 fully resident in VMEM."""
    x = x_ref[...].astype(jnp.float32)

    # LayerNorm over last dim (f32 stats, biased variance like torch).
    mean = jnp.mean(x, axis=-1, keepdims=True)
    c = x - mean
    var = jnp.mean(c * c, axis=-1, keepdims=True)
    xn = c * jax.lax.rsqrt(var + LN_EPS)
    xn = xn * gamma_ref[...].astype(jnp.float32) + beta_ref[...].astype(jnp.float32)

    # Linear 1: (tm, D) @ (D, H) + b1  — bf16 MXU operands, f32 accumulation.
    w1 = w1_ref[...]
    h = jnp.dot(xn.astype(w1.dtype), w1, preferred_element_type=jnp.float32)
    h = h + b1_ref[...].astype(jnp.float32)

    # Swish via a single EUP tanh: sigmoid(x) = 0.5*tanh(0.5*x) + 0.5.
    h = h * (0.5 * jnp.tanh(0.5 * h) + 0.5)

    # TODO(synk): nn.Dropout is identity in eval mode; training-mode dropout
    # (pltpu.prng_*) intentionally not applied.

    # Linear 2: (tm, H) @ (H, D) + b2.
    w2 = w2_ref[...]
    y = jnp.dot(h.astype(w2.dtype), w2, preferred_element_type=jnp.float32)
    y = y + b2_ref[...].astype(jnp.float32)
    o_ref[...] = y.astype(o_ref.dtype)


def ffn_streamed_kernel(x_ref, gamma_ref, beta_ref, w1_ref, b1_ref, w2_ref,
                        b2_ref, o_ref, xn_ref, acc_ref):
    """FFN with the hidden (H) dimension streamed in panels of size th.

    Grid is (row_tiles, H_tiles); the H axis is "arbitrary" and accumulates the
    second matmul into a (tm, D) f32 VMEM scratch. LayerNorm is computed once
    per row tile (h == 0) into an MXU-dtype scratch.
    """
    h_idx = pl.program_id(1)

    @pl.when(h_idx == 0)
    def _():
        x = x_ref[...].astype(jnp.float32)
        mean = jnp.mean(x, axis=-1, keepdims=True)
        c = x - mean
        var = jnp.mean(c * c, axis=-1, keepdims=True)
        xn = c * jax.lax.rsqrt(var + LN_EPS)
        xn = xn * gamma_ref[...].astype(jnp.float32) + beta_ref[...].astype(jnp.float32)
        xn_ref[...] = xn.astype(xn_ref.dtype)
        acc_ref[...] = jnp.zeros_like(acc_ref)

    # Linear 1 panel: (tm, D) @ (D, th) + b1[th]
    w1 = w1_ref[...]
    h = jnp.dot(xn_ref[...], w1, preferred_element_type=jnp.float32)
    h = h + b1_ref[...].astype(jnp.float32)
    h = h * (0.5 * jnp.tanh(0.5 * h) + 0.5)  # Swish (single EUP tanh)

    # Linear 2 panel: accumulate (tm, th) @ (th, D) into f32 scratch.
    w2 = w2_ref[...]
    acc_ref[...] += jnp.dot(h.astype(w2.dtype), w2,
                            preferred_element_type=jnp.float32)

    # Write every step (last write wins); output block index is constant over
    # the H axis so it stays resident until the row tile changes.
    y = acc_ref[...] + b2_ref[...].astype(jnp.float32)
    o_ref[...] = y.astype(o_ref.dtype)


# ---------------------------------------------------------------------------
# Planning helpers (all Python ints -> static under jit)
# ---------------------------------------------------------------------------
def _vmem_capacity_bytes():
    try:
        return int(pltpu.get_tpu_info().vmem_capacity_bytes)
    except Exception:
        return 64 * _MIB  # conservative: v7x per-TensorCore VMEM


def _round_up(n, m):
    return ((n + m - 1) // m) * m


def _row_tiles(pref, m8):
    out = []
    for t in (pref, 256, 128, 64, 32, 16, 8):
        if t <= pref and t <= m8 and t not in out:
            out.append(t)
    return out


def _select_plan(M, D, H, act_bytes, w_bytes, h_tile, vmem_cap):
    """Pick (mode, tm, th, vmem_limit_bytes) from a VMEM budget."""
    budget = vmem_cap - 24 * _MIB          # leave room for internal scratch
    m8 = _round_up(max(M, 1), 8)
    tm_pref = 512 if vmem_cap >= 96 * _MIB else 256
    tms = _row_tiles(tm_pref, m8)

    def fused_est(tm):
        weights = 4 * D * H * w_bytes                  # W1 + W2, double-buffered
        streams = 4 * tm * D * act_bytes               # x + out, double-buffered
        temps = 4 * tm * (4 * H + 5 * D)               # generous f32 intermediates
        return weights + streams + temps

    def streamed_est(tm, th):
        weights = 8 * D * th * w_bytes                 # W1/W2 panels, double-buffered
        streams = 4 * tm * D * act_bytes
        scratch = 4 * tm * D * 2                       # xn + f32 accumulator
        temps = 4 * tm * (4 * th + 3 * D)
        return weights + streams + scratch + temps

    def finalize(mode, tm, th, est):
        limit = min(vmem_cap - 16 * _MIB, max(48 * _MIB, est + 16 * _MIB))
        return mode, tm, th, int(limit)

    if h_tile is not None:  # streamed path forced by caller
        tm = next((t for t in tms if streamed_est(t, h_tile) <= budget), tms[-1])
        return finalize("streamed", tm, h_tile, streamed_est(tm, h_tile))

    for tm in tms:
        if fused_est(tm) <= budget:
            return finalize("fused", tm, None, fused_est(tm))

    for tm in tms:
        for th in (512, 256, 128):
            if th <= H and H % th == 0 and streamed_est(tm, th) <= budget:
                return finalize("streamed", tm, th, streamed_est(tm, th))

    # TODO(synk): absurdly large D/H with no divisible H tile — fall back to
    # the smallest fused tile and hope the VMEM limit suffices.
    tm = tms[-1]
    return finalize("fused", tm, None, fused_est(tm))


# ---------------------------------------------------------------------------
# Public entry point
# ---------------------------------------------------------------------------
@functools.partial(jax.jit, static_argnames=("h_tile", "mxu_dtype"))
def feed_forward_module(x, gamma, beta, w1, b1, w2, b2, *, h_tile=None,
                        mxu_dtype=jnp.bfloat16):
    """x: (B, T, D). Returns (B, T, D). h_tile forces the H-streamed path."""
    B, T, D = x.shape
    H = w1.shape[1]
    M = B * T

    if h_tile is not None and (H % h_tile != 0 or h_tile % 128 != 0):
        raise ValueError("h_tile must divide H and be a multiple of 128")

    # Feed the MXU in bf16 (f32 accumulation via preferred_element_type).
    w1m = w1.astype(mxu_dtype)
    w2m = w2.astype(mxu_dtype)

    x2d = x.reshape(M, D)
    gamma2d = gamma.reshape(1, D)
    beta2d = beta.reshape(1, D)
    b1_2d = b1.reshape(1, H)
    b2_2d = b2.reshape(1, D)

    vmem_cap = _vmem_capacity_bytes()
    mode, tm, th, vmem_limit = _select_plan(
        M, D, H, x.dtype.itemsize, jnp.dtype(mxu_dtype).itemsize, h_tile,
        vmem_cap)

    grid_m = pl.cdiv(M, tm)  # pad-free: boundary blocks are masked by Pallas

    if mode == "fused":
        out = pl.pallas_call(
            ffn_fused_kernel,
            out_shape=jax.ShapeDtypeStruct((M, D), x.dtype),
            grid_spec=pltpu.PrefetchScalarGridSpec(
                num_scalar_prefetch=0,
                grid=(grid_m,),
                in_specs=[
                    pl.BlockSpec((tm, D), lambda i: (i, 0)),   # x rows
                    pl.BlockSpec((1, D), lambda i: (0, 0)),    # gamma
                    pl.BlockSpec((1, D), lambda i: (0, 0)),    # beta
                    pl.BlockSpec((D, H), lambda i: (0, 0)),    # W1 (resident)
                    pl.BlockSpec((1, H), lambda i: (0, 0)),    # b1
                    pl.BlockSpec((H, D), lambda i: (0, 0)),    # W2 (resident)
                    pl.BlockSpec((1, D), lambda i: (0, 0)),    # b2
                ],
                out_specs=pl.BlockSpec((tm, D), lambda i: (i, 0)),
            ),
            compiler_params=pltpu.CompilerParams(
                dimension_semantics=("parallel",),
                vmem_limit_bytes=vmem_limit,
            ),
        )(x2d, gamma2d, beta2d, w1m, b1_2d, w2m, b2_2d)
    else:
        grid_h = H // th
        out = pl.pallas_call(
            ffn_streamed_kernel,
            out_shape=jax.ShapeDtypeStruct((M, D), x.dtype),
            grid_spec=pltpu.PrefetchScalarGridSpec(
                num_scalar_prefetch=0,
                grid=(grid_m, grid_h),
                in_specs=[
                    pl.BlockSpec((tm, D), lambda i, h: (i, 0)),   # x rows
                    pl.BlockSpec((1, D), lambda i, h: (0, 0)),    # gamma
                    pl.BlockSpec((1, D), lambda i, h: (0, 0)),    # beta
                    pl.BlockSpec((D, th), lambda i, h: (0, h)),   # W1 panel
                    pl.BlockSpec((1, th), lambda i, h: (0, h)),   # b1 panel
                    pl.BlockSpec((th, D), lambda i, h: (h, 0)),   # W2 panel
                    pl.BlockSpec((1, D), lambda i, h: (0, 0)),    # b2
                ],
                out_specs=pl.BlockSpec((tm, D), lambda i, h: (i, 0)),
                scratch_shapes=[
                    pltpu.VMEM((tm, D), mxu_dtype),    # LayerNorm output
                    pltpu.VMEM((tm, D), jnp.float32),  # f32 accumulator
                ],
            ),
            compiler_params=pltpu.CompilerParams(
                dimension_semantics=("parallel", "arbitrary"),
                vmem_limit_bytes=vmem_limit,
            ),
        )(x2d, gamma2d, beta2d, w1m, b1_2d, w2m, b2_2d)

    return out.reshape(B, T, D)


# ---------------------------------------------------------------------------
# Pure-JAX reference
# ---------------------------------------------------------------------------
def reference_ffn(x, gamma, beta, w1, b1, w2, b2):
    xf = x.astype(jnp.float32)
    mean = jnp.mean(xf, axis=-1, keepdims=True)
    var = jnp.mean((xf - mean) ** 2, axis=-1, keepdims=True)
    xn = (xf - mean) * jax.lax.rsqrt(var + LN_EPS) * gamma + beta
    h = xn @ w1.astype(jnp.float32) + b1
    h = h * jax.nn.sigmoid(h)
    y = h @ w2.astype(jnp.float32) + b2
    return y.astype(x.dtype)


if __name__ == "__main__":
    # Small but lane-dense shapes consistent with (batch, time, dim) inputs.
    B, T, D = 2, 8, 128
    EXPANSION = 4
    H = D * EXPANSION  # 512

    key = jax.random.PRNGKey(0)
    kx, kw1, kb1, kw2, kb2, kx2 = jax.random.split(key, 6)

    x = jax.random.normal(kx, (B, T, D), dtype=jnp.float32)
    gamma = jnp.ones((D,), jnp.float32)
    beta = jnp.zeros((D,), jnp.float32)
    w1 = jax.random.normal(kw1, (D, H), dtype=jnp.float32) * (1.0 / D ** 0.5)
    b1 = jax.random.normal(kb1, (H,), dtype=jnp.float32) * 0.01
    w2 = jax.random.normal(kw2, (H, D), dtype=jnp.float32) * (1.0 / H ** 0.5)
    b2 = jax.random.normal(kb2, (D,), dtype=jnp.float32) * 0.01

    # Reference uses the same bf16-rounded weights the kernel feeds the MXU;
    # remaining mismatch is only the bf16 activation cast at each dot.
    w1_r = w1.astype(jnp.bfloat16).astype(jnp.float32)
    w2_r = w2.astype(jnp.bfloat16).astype(jnp.float32)

    # 1) Fused path (auto-selected at these sizes).
    out = jax.block_until_ready(feed_forward_module(x, gamma, beta, w1, b1, w2, b2))
    ref = reference_ffn(x, gamma, beta, w1_r, b1, w2_r, b2)
    assert out.shape == (B, T, D)
    assert jnp.allclose(out, ref, atol=3e-2, rtol=3e-2)

    # 2) H-streamed weight-pipeline path (auto-selected when weights + hidden
    #    exceed the VMEM budget; forced here so the small demo exercises it).
    out_s = jax.block_until_ready(
        feed_forward_module(x, gamma, beta, w1, b1, w2, b2, h_tile=128))
    assert jnp.allclose(out_s, ref, atol=3e-2, rtol=3e-2)

    # 3) Pad-free ragged rows: M = B*T not a multiple of the row tile.
    x3 = jax.random.normal(kx2, (B, 11, D), dtype=jnp.float32)
    out_r = jax.block_until_ready(
        feed_forward_module(x3, gamma, beta, w1, b1, w2, b2))
    ref_r = reference_ffn(x3, gamma, beta, w1_r, b1, w2_r, b2)
    assert jnp.allclose(out_r, ref_r, atol=3e-2, rtol=3e-2)

    print("KERNEL_OK")
</pallas_src>

<mosaic_0001>
module attributes {stable_mosaic.version = 11 : i64} {
  func.func @ffn_fused_kernel(%arg0: i32, %arg1: memref<16x128xf32, #tpu.memory_space<vmem>>, %arg2: memref<1x128xf32, #tpu.memory_space<vmem>>, %arg3: memref<1x128xf32, #tpu.memory_space<vmem>>, %arg4: memref<128x512xbf16, #tpu.memory_space<vmem>>, %arg5: memref<1x512xf32, #tpu.memory_space<vmem>>, %arg6: memref<512x128xbf16, #tpu.memory_space<vmem>>, %arg7: memref<1x128xf32, #tpu.memory_space<vmem>>, %arg8: memref<16x128xf32, #tpu.memory_space<vmem>>) attributes {dimension_semantics = [#tpu.dimension_semantics<parallel>], iteration_bounds = array<i64: 1>, scalar_prefetch = 0 : i64, scratch_operands = 0 : i64, tpu.core_type = #tpu.core_type<tc>, window_params = [{transform_indices = @transform_0, window_bounds = array<i64: 16, 128>}, {pipeline_mode = #tpu.pipeline_mode<synchronous>, transform_indices = @transform_1, window_bounds = array<i64: 1, 128>}, {pipeline_mode = #tpu.pipeline_mode<synchronous>, transform_indices = @transform_2, window_bounds = array<i64: 1, 128>}, {pipeline_mode = #tpu.pipeline_mode<synchronous>, transform_indices = @transform_3, window_bounds = array<i64: 128, 512>}, {pipeline_mode = #tpu.pipeline_mode<synchronous>, transform_indices = @transform_4, window_bounds = array<i64: 1, 512>}, {pipeline_mode = #tpu.pipeline_mode<synchronous>, transform_indices = @transform_5, window_bounds = array<i64: 512, 128>}, {pipeline_mode = #tpu.pipeline_mode<synchronous>, transform_indices = @transform_6, window_bounds = array<i64: 1, 128>}, {transform_indices = @transform_7, window_bounds = array<i64: 16, 128>}]} {
    %c0 = arith.constant 0 : index
    %c0_0 = arith.constant 0 : index
    %0 = vector.load %arg1[%c0, %c0_0] : memref<16x128xf32, #tpu.memory_space<vmem>>, vector<16x128xf32>
    %cst = arith.constant dense<0.000000e+00> : vector<16xf32>
    %1 = vector.multi_reduction <add>, %0, %cst [1] : vector<16x128xf32> to vector<16xf32>
    %2 = vector.shape_cast %1 : vector<16xf32> to vector<16x1xf32>
    %cst_1 = arith.constant 1.280000e+02 : f32
    %3 = vector.broadcast %cst_1 : f32 to vector<16x1xf32>
    %4 = arith.divf %2, %3 : vector<16x1xf32>
    %5 = vector.broadcast %4 : vector<16x1xf32> to vector<16x128xf32>
    %6 = arith.subf %0, %5 : vector<16x128xf32>
    %7 = arith.mulf %6, %6 : vector<16x128xf32>
    %cst_2 = arith.constant dense<0.000000e+00> : vector<16xf32>
    %8 = vector.multi_reduction <add>, %7, %cst_2 [1] : vector<16x128xf32> to vector<16xf32>
    %9 = vector.shape_cast %8 : vector<16xf32> to vector<16x1xf32>
    %cst_3 = arith.constant 1.280000e+02 : f32
    %10 = vector.broadcast %cst_3 : f32 to vector<16x1xf32>
    %11 = arith.divf %9, %10 : vector<16x1xf32>
    %cst_4 = arith.constant 9.99999974E-6 : f32
    %12 = vector.broadcast %cst_4 : f32 to vector<16x1xf32>
    %13 = arith.addf %11, %12 : vector<16x1xf32>
    %14 = math.rsqrt %13 : vector<16x1xf32>
    %15 = vector.broadcast %14 : vector<16x1xf32> to vector<16x128xf32>
    %16 = arith.mulf %6, %15 : vector<16x128xf32>
    %c0_5 = arith.constant 0 : index
    %c0_6 = arith.constant 0 : index
    %17 = vector.load %arg2[%c0_5, %c0_6] : memref<1x128xf32, #tpu.memory_space<vmem>>, vector<1x128xf32>
    %18 = vector.broadcast %17 : vector<1x128xf32> to vector<16x128xf32>
    %19 = arith.mulf %16, %18 : vector<16x128xf32>
    %c0_7 = arith.constant 0 : index
    %c0_8 = arith.constant 0 : index
    %20 = vector.load %arg3[%c0_7, %c0_8] : memref<1x128xf32, #tpu.memory_space<vmem>>, vector<1x128xf32>
    %21 = vector.broadcast %20 : vector<1x128xf32> to vector<16x128xf32>
    %22 = arith.addf %19, %21 : vector<16x128xf32>
    %c0_9 = arith.constant 0 : index
    %c0_10 = arith.constant 0 : index
    %23 = vector.load %arg4[%c0_9, %c0_10] : memref<128x512xbf16, #tpu.memory_space<vmem>>, vector<128x512xbf16>
    %24 = arith.truncf %22 : vector<16x128xf32> to vector<16x128xbf16>
    %cst_11 = arith.constant dense<0.000000e+00> : vector<16x512xf32>
    %25 = tpu.matmul %24, %23, %cst_11 {dimension_numbers = #tpu.dot_dimension_numbers<[1], [0], [0], [1], [0, 0, 1, 1], [], []>} : vector<16x128xbf16>, vector<128x512xbf16>, vector<16x512xf32> -> vector<16x512xf32>
    %c0_12 = arith.constant 0 : index
    %c0_13 = arith.constant 0 : index
    %26 = vector.load %arg5[%c0_12, %c0_13] : memref<1x512xf32, #tpu.memory_space<vmem>>, vector<1x512xf32>
    %27 = vector.broadcast %26 : vector<1x512xf32> to vector<16x512xf32>
    %28 = arith.addf %25, %27 : vector<16x512xf32>
    %cst_14 = arith.constant 5.000000e-01 : f32
    %29 = vector.broadcast %cst_14 : f32 to vector<16x512xf32>
    %30 = arith.mulf %29, %28 : vector<16x512xf32>
    %31 = math.tanh %30 : vector<16x512xf32>
    %cst_15 = arith.constant 5.000000e-01 : f32
    %32 = vector.broadcast %cst_15 : f32 to vector<16x512xf32>
    %33 = arith.mulf %32, %31 : vector<16x512xf32>
    %cst_16 = arith.constant 5.000000e-01 : f32
    %34 = vector.broadcast %cst_16 : f32 to vector<16x512xf32>
    %35 = arith.addf %33, %34 : vector<16x512xf32>
    %36 = arith.mulf %28, %35 : vector<16x512xf32>
    %c0_17 = arith.constant 0 : index
    %c0_18 = arith.constant 0 : index
    %37 = vector.load %arg6[%c0_17, %c0_18] : memref<512x128xbf16, #tpu.memory_space<vmem>>, vector<512x128xbf16>
    %38 = arith.truncf %36 : vector<16x512xf32> to vector<16x512xbf16>
    %cst_19 = arith.constant dense<0.000000e+00> : vector<16x128xf32>
    %39 = tpu.matmul %38, %37, %cst_19 {dimension_numbers = #tpu.dot_dimension_numbers<[1], [0], [0], [1], [0, 0, 1, 1], [], []>} : vector<16x512xbf16>, vector<512x128xbf16>, vector<16x128xf32> -> vector<16x128xf32>
    %c0_20 = arith.constant 0 : index
    %c0_21 = arith.constant 0 : index
    %40 = vector.load %arg7[%c0_20, %c0_21] : memref<1x128xf32, #tpu.memory_space<vmem>>, vector<1x128xf32>
    %41 = vector.broadcast %40 : vector<1x128xf32> to vector<16x128xf32>
    %42 = arith.addf %39, %41 : vector<16x128xf32>
    %c0_22 = arith.constant 0 : index
    %c0_23 = arith.constant 0 : index
    %43 = vector.load %arg8[%c0_22, %c0_23] : memref<16x128xf32, #tpu.memory_space<vmem>>, vector<16x128xf32>
    tpu.vector_store %arg8[%c0_22, %c0_23], %42 {strides = array<i32>} : memref<16x128xf32, #tpu.memory_space<vmem>>, vector<16x128xf32>,
    return
  }
  func.func @transform_0(%arg0: i32) -> (i32, i32) {
    %c0_i32 = arith.constant 0 : i32
    %c0_i32_0 = arith.constant 0 : i32
    return %arg0, %c0_i32 : i32, i32
  }
  func.func @transform_1(%arg0: i32) -> (i32, i32) {
    %c0_i32 = arith.constant 0 : i32
    %c0_i32_0 = arith.constant 0 : i32
    %c0_i32_1 = arith.constant 0 : i32
    return %c0_i32, %c0_i32_0 : i32, i32
  }
  func.func @transform_2(%arg0: i32) -> (i32, i32) {
    %c0_i32 = arith.constant 0 : i32
    %c0_i32_0 = arith.constant 0 : i32
    %c0_i32_1 = arith.constant 0 : i32
    return %c0_i32, %c0_i32_0 : i32, i32
  }
  func.func @transform_3(%arg0: i32) -> (i32, i32) {
    %c0_i32 = arith.constant 0 : i32
    %c0_i32_0 = arith.constant 0 : i32
    %c0_i32_1 = arith.constant 0 : i32
    return %c0_i32, %c0_i32_0 : i32, i32
  }
  func.func @transform_4(%arg0: i32) -> (i32, i32) {
    %c0_i32 = arith.constant 0 : i32
    %c0_i32_0 = arith.constant 0 : i32
    %c0_i32_1 = arith.constant 0 : i32
    return %c0_i32, %c0_i32_0 : i32, i32
  }
  func.func @transform_5(%arg0: i32) -> (i32, i32) {
    %c0_i32 = arith.constant 0 : i32
    %c0_i32_0 = arith.constant 0 : i32
    %c0_i32_1 = arith.constant 0 : i32
    return %c0_i32, %c0_i32_0 : i32, i32
  }
  func.func @transform_6(%arg0: i32) -> (i32, i32) {
    %c0_i32 = arith.constant 0 : i32
    %c0_i32_0 = arith.constant 0 : i32
    %c0_i32_1 = arith.constant 0 : i32
    return %c0_i32, %c0_i32_0 : i32, i32
  }
  func.func @transform_7(%arg0: i32) -> (i32, i32) {
    %c0_i32 = arith.constant 0 : i32
    %c0_i32_0 = arith.constant 0 : i32
    return %arg0, %c0_i32 : i32, i32
  }
}

</mosaic_0001>

<bundles_post_ra>
// kernel: feed_forward_module.1
= control target key start
LH: loop header
LB: loop body
LE: loop exit
PB: predicated region body
PF: predicated region fallthrough
CT: control target
= control target key end

     0   :  { %s1294_s0 = inlined_call_operand.vmem [shape: f32[16,128], index: 0, kind: input, shape index: {}]   ;;  %s1295_s1 = inlined_call_operand.vmem [shape: f32[1,128], index: 1, kind: input, shape index: {}]   ;;  %s1296_s2 = inlined_call_operand.vmem [shape: f32[1,128], index: 2, kind: input, shape index: {}]   ;;  %s1297_s3 = inlined_call_operand.vmem [shape: bf16[128,512], index: 3, kind: input, shape index: {}]   ;;  %s1298_s4 = inlined_call_operand.vmem [shape: f32[1,512], index: 4, kind: input, shape index: {}]   ;;  %s1299_s5 = inlined_call_operand.vmem [shape: bf16[512,128], index: 5, kind: input, shape index: {}]   ;;  %s1300_s6 = inlined_call_operand.vmem [shape: f32[1,128], index: 6, kind: input, shape index: {}]   ;;  %s1301_s7 = inlined_call_operand.hbm [shape: f32[16,128], index: 7, kind: output, shape index: {}]  }
   0x1   :  { %v28_v0 = vld [vmem:[%s1294_s0] sm:$0xff]  ;;  %v29_v1 = vld [vmem:[%s1294_s0 + $0x8] sm:$0xff] }
   0x2   :  { %30 = vadd.xlane.f32.xlu0 %v28_v0  ;;  %v894_v2 = vld [vmem:[%s1297_s3 + $0x4] ss:$16 sps:$4 sm:$0xff]   ;;  %v896_v3 = vld [vmem:[%s1297_s3 + $0xc] ss:$16 sps:$4 sm:$0xff]   ;;  %v898_v4 = vld [vmem:[%s1297_s3] ss:$16 sps:$4 sm:$0xff]  }
   0x3   :  { %v899_v5 = vld [vmem:[%s1297_s3 + $0x8] ss:$16 sps:$4 sm:$0xff]   ;;  %v900_v6 = vld [vmem:[%s1297_s3 + $0x24] ss:$16 sps:$4 sm:$0xff]   ;;  %v902_v7 = vld [vmem:[%s1297_s3 + $0x2c] ss:$16 sps:$4 sm:$0xff]   ;;  %286 = vmatprep.subr.bf16.mxu0 %v894_v2  ;;  %329 = vmatprep.subr.bf16.mxu1 %v896_v3 }
   0x4   :  { %287 = vmatpush1.bf16.msra.mxu0 %v898_v4  ;;  %330 = vmatpush1.bf16.msra.mxu1 %v899_v5 }
   0x5   :  { %288 = vmatprep.subr.bf16.mxu0 %v900_v6  ;;  %331 = vmatprep.subr.bf16.mxu1 %v902_v7 }
   0x6   :  { %32 = vadd.xlane.f32.xlu0 %v29_v1 }
   0x7   :  { %12 = vsyncpa [#allocation3], 0  ;;  %v904_v16 = vld [vmem:[%s1297_s3 + $0x20] ss:$16 sps:$4 sm:$0xff]   ;;  %v905_v17 = vld [vmem:[%s1297_s3 + $0x28] ss:$16 sps:$4 sm:$0xff]  }
   0x8   :  { %289 = vmatpush1.bf16.msra.mxu0 %v904_v16  ;;  %332 = vmatpush1.bf16.msra.mxu1 %v905_v17  ;;  %v906_v18 = vld [vmem:[%s1297_s3 + $0x44] ss:$16 sps:$4 sm:$0xff]   ;;  %v908_v19 = vld [vmem:[%s1297_s3 + $0x4c] ss:$16 sps:$4 sm:$0xff]   ;;  %v910_v20 = vld [vmem:[%s1297_s3 + $0x40] ss:$16 sps:$4 sm:$0xff]  }
   0x9   :  { %v911_v21 = vld [vmem:[%s1297_s3 + $0x48] ss:$16 sps:$4 sm:$0xff]   ;;  %290 = vmatprep.subr.bf16.mxu0 %v906_v18  ;;  %333 = vmatprep.subr.bf16.mxu1 %v908_v19  ;;  %v912_v22 = vld [vmem:[%s1297_s3 + $0x64] ss:$16 sps:$4 sm:$0xff]   ;;  %v914_v23 = vld [vmem:[%s1297_s3 + $0x6c] ss:$16 sps:$4 sm:$0xff]  }
   0xa   :  { %v916_v24 = vld [vmem:[%s1297_s3 + $0x60] ss:$16 sps:$4 sm:$0xff]   ;;  %v917_v25 = vld [vmem:[%s1297_s3 + $0x68] ss:$16 sps:$4 sm:$0xff]   ;;  %v918_v26 = vld [vmem:[%s1297_s3 + $0x84] ss:$16 sps:$4 sm:$0xff]  }
   0xb   :  { %v920_v27 = vld [vmem:[%s1297_s3 + $0x8c] ss:$16 sps:$4 sm:$0xff]   ;;  %v922_v28 = vld [vmem:[%s1297_s3 + $0x80] ss:$16 sps:$4 sm:$0xff]   ;;  %v923_v29 = vld [vmem:[%s1297_s3 + $0x88] ss:$16 sps:$4 sm:$0xff]  }
   0xc   :  { %291 = vmatpush1.bf16.msra.mxu0 %v910_v20  ;;  %334 = vmatpush1.bf16.msra.mxu1 %v911_v21  ;;  %v924_v30 = vld [vmem:[%s1297_s3 + $0xa4] ss:$16 sps:$4 sm:$0xff]   ;;  %v926_v31 = vld [vmem:[%s1297_s3 + $0xac] ss:$16 sps:$4 sm:$0xff]   ;;  %v928_v32 = vld [vmem:[%s1297_s3 + $0xa0] ss:$16 sps:$4 sm:$0xff]  }
   0xd   :  { %292 = vmatprep.subr.bf16.mxu0 %v912_v22  ;;  %335 = vmatprep.subr.bf16.mxu1 %v914_v23  ;;  %v929_v33 = vld [vmem:[%s1297_s3 + $0xa8] ss:$16 sps:$4 sm:$0xff]   ;;  %v930_v34 = vld [vmem:[%s1297_s3 + $0xc4] ss:$16 sps:$4 sm:$0xff]   ;;  %v932_v35 = vld [vmem:[%s1297_s3 + $0xcc] ss:$16 sps:$4 sm:$0xff]  }
   0xe   :  { %v1018_v36 = vmov 0   ;;  %v934_v37 = vld [vmem:[%s1297_s3 + $0xc0] ss:$16 sps:$4 sm:$0xff]   ;;  %v935_v38 = vld [vmem:[%s1297_s3 + $0xc8] ss:$16 sps:$4 sm:$0xff]   ;;  %s1019_s10 = smov [#allocation2]  }
   0xf   :  { %318 = vmatprep.mubr.bf16.mxu0 %v1018_v36  ;;  %361 = vmatprep.mubr.bf16.mxu1 %v1018_v36  ;;  %v936_v39 = vld [vmem:[%s1297_s3 + $0xe4] ss:$16 sps:$4 sm:$0xff]   ;;  %v938_v40 = vld [vmem:[%s1297_s3 + $0xec] ss:$16 sps:$4 sm:$0xff]   ;;  %v940_v41 = vld [vmem:[%s1297_s3 + $0xe0] ss:$16 sps:$4 sm:$0xff]  }
  0x10   :  { %293 = vmatpush1.bf16.msra.mxu0 %v916_v24  ;;  %336 = vmatpush1.bf16.msra.mxu1 %v917_v25  ;;  %v941_v42 = vld [vmem:[%s1297_s3 + $0xe8] ss:$16 sps:$4 sm:$0xff]   ;;  %v942_v43 = vld [vmem:[%s1299_s5 + $0x40] sm:$0xff]   ;;  %v950_v4 = vld [vmem:[%s1299_s5 + $0x50] sm:$0xff]   ;;  %s768_s11 = sshll.u32 %s1019_s10, 4  ;;  %s769_s11 = int_to_ptr.vmem [resolvable:$true] %s768_s11 }
  0x11   :  { %294 = vmatprep.subr.bf16.mxu0 %v918_v26  ;;  %337 = vmatprep.subr.bf16.mxu1 %v920_v27  ;;  %v943_v44 = vld [vmem:[%s1299_s5 + $0xc0] sm:$0xff]   ;;  %v948_v2 = vld [vmem:[%s1299_s5 + $0x8] sm:$0xff]   ;;  %v951_v5 = vld [vmem:[%s1299_s5 + $0xd0] sm:$0xff]   ;;  %p999_p1 = scmp.lt.s32.totalorder %s769_s11, %s769_s11 }
  0x12   :  { %v779_v53 = vld [vmem:[%s1295_s1] ss:$0 sm:$0xff]  ;;  %v949_v3 = vld [vmem:[%s1299_s5 + $0x88] sm:$0xff]   ;;  %v952_v6 = vld [vmem:[%s1299_s5 + $0x10] sm:$0xff]  }
  0x13   :  { %v780_v57 = vld [vmem:[%s1296_s2] ss:$0 sm:$0xff]  ;;  %v953_v7 = vld [vmem:[%s1299_s5 + $0x90] sm:$0xff]   ;;  %v962_v16 = vld [vmem:[%s1299_s5 + $0x68] sm:$0xff]  }
  0x14   :  { %295 = vmatpush1.bf16.msra.mxu0 %v922_v28  ;;  %338 = vmatpush1.bf16.msra.mxu1 %v923_v29  ;;  %v944_v61 = vld [vmem:[%s1299_s5] sm:$0xff]   ;;  %v963_v17 = vld [vmem:[%s1299_s5 + $0xe8] sm:$0xff]   ;;  %v966_v20 = vld [vmem:[%s1299_s5 + $0x70] sm:$0xff]   ;;  %v106_v28 = vlaneseq }
  0x15   :  { %296 = vmatprep.subr.bf16.mxu0 %v924_v30  ;;  %339 = vmatprep.subr.bf16.mxu1 %v926_v31  ;;  %v945_v62 = vld [vmem:[%s1299_s5 + $0x80] sm:$0xff]   ;;  %v964_v18 = vld [vmem:[%s1299_s5 + $0x28] sm:$0xff]   ;;  %v967_v21 = vld [vmem:[%s1299_s5 + $0xf0] sm:$0xff]  }
  0x16   :  { %v965_v19 = vld [vmem:[%s1299_s5 + $0xa8] sm:$0xff]   ;;  %v968_v22 = vld [vmem:[%s1299_s5 + $0x30] sm:$0xff]   ;;  %v970_v24 = vld [vmem:[%s1299_s5 + $0x78] sm:$0xff]   ;;  %v107_v29 = vshrl.u32 %v106_v28, 7 }
  0x17   :  { %v969_v23 = vld [vmem:[%s1299_s5 + $0xb0] sm:$0xff]   ;;  %v971_v25 = vld [vmem:[%s1299_s5 + $0xf8] sm:$0xff]  }
  0x18   :  { %297 = vmatpush1.bf16.msra.mxu0 %v928_v32  ;;  %340 = vmatpush1.bf16.msra.mxu1 %v929_v33  ;;  %v972_v26 = vld [vmem:[%s1299_s5 + $0x38] sm:$0xff]   ;;  %v108_v30 = vsub.s32 0, %v107_v29  ;;  %v116_v31 = vsub.s32 2, %v107_v29  ;;  %v104_v32 = vld [vmem:[%s1298_s4] sm:$0xf]  ;;  %v112_v33 = vsub.s32 1, %v107_v29 }
  0x19   :  { %298 = vmatprep.subr.bf16.mxu0 %v930_v34  ;;  %341 = vmatprep.subr.bf16.mxu1 %v932_v35  ;;  %v973_v27 = vld [vmem:[%s1299_s5 + $0xb8] sm:$0xff]   ;;  %v120_v34 = vsub.s32 3, %v107_v29 }
  0x1a   :  { %v109_v35 = vrot.slane %v104_v32, %v108_v30  ;;  %v117_v36 = vrot.slane %v104_v32, %v116_v31 }
  0x1c   :  { %299 = vmatpush1.bf16.msra.mxu0 %v934_v37  ;;  %342 = vmatpush1.bf16.msra.mxu1 %v935_v38  ;;  %v113_v37 = vrot.slane %v104_v32, %v112_v33  ;;  %v121_v38 = vrot.slane %v104_v32, %v120_v34 }
  0x1d   :  { %300 = vmatprep.subr.bf16.mxu0 %v936_v39  ;;  %343 = vmatprep.subr.bf16.mxu1 %v938_v40 }
  0x20   :  { %301 = vmatpush1.bf16.msra.mxu0 %v940_v41  ;;  %344 = vmatpush1.bf16.msra.mxu1 %v941_v42 }
  0x21   :  { %846 = vmatprep.subr.bf16.mxu0 %v942_v43  ;;  %868 = vmatprep.subr.bf16.mxu1 %v943_v44 }
  0x8f   :  { %v31_v8 = vpop.xlane.xlu0 %30 }
  0x90   :  { %v35_v9 = vmul.f32 0.0078125, %v31_v8  ;;  %v954_v8 = vld [vmem:[%s1299_s5 + $0x58] sm:$0xff]  }
  0x92   :  { %v1086_v10 = vsub.f32 %v28_v0, %v35_v9  ;;  %v946_v0 = vld [vmem:[%s1299_s5 + $0x48] sm:$0xff]   ;;  %v955_v9 = vld [vmem:[%s1299_s5 + $0xd8] sm:$0xff]  }
  0x93   :  { %v33_v11 = vpop.xlane.xlu0 %32 }
  0x94   :  { %v36_v12 = vmul.f32 0.0078125, %v33_v11  ;;  %v39_v13 = vmul.f32 %v1086_v10, %v1086_v10  ;;  %v957_v11 = vld [vmem:[%s1299_s5 + $0x98] sm:$0xff]  }
  0x96   :  { %v1090_v14 = vsub.f32 %v29_v1, %v36_v12  ;;  %41 = vadd.xlane.f32.xlu1 %v39_v13  ;;  %v947_v1 = vld [vmem:[%s1299_s5 + $0xc8] sm:$0xff]   ;;  %v958_v12 = vld [vmem:[%s1299_s5 + $0x60] sm:$0xff]  }
  0x97   :  { %v959_v13 = vld [vmem:[%s1299_s5 + $0xe0] sm:$0xff]  }
  0x98   :  { %v40_v15 = vmul.f32 %v1090_v14, %v1090_v14 }
  0x9a   :  { %43 = vadd.xlane.f32.xlu1 %v40_v15  ;;  %v961_v15 = vld [vmem:[%s1299_s5 + $0xa0] sm:$0xff]  }
 0x123   :  { %v42_v45 = vpop.xlane.xlu1 %41 }
 0x124   :  { %v45_v46 = vmul.f32 0.0078125, %v42_v45 }
 0x126   :  { %v47_v47 = vadd.f32 1e-05, %v45_v46 }
 0x127   :  { %v44_v48 = vpop.xlane.xlu1 %43 }
 0x128   :  { %974 = vrsqrt.f32 %v47_v47  ;;  %v46_v49 = vmul.f32 0.0078125, %v44_v48 }
 0x12a   :  { %v48_v50 = vadd.f32 1e-05, %v46_v49 }
 0x12c   :  { %976 = vrsqrt.f32 %v48_v50 }
 0x132   :  { %v975_v51 = vpop.eup %974 }
 0x133   :  { %v51_v52 = vmul.f32 %v975_v51, %v1086_v10  ;;  %v956_v10 = vld [vmem:[%s1299_s5 + $0x18] sm:$0xff]  }
 0x135   :  { %v60_v56 = vmul.f32 %v779_v53, %v51_v52 }
 0x136   :  { %v977_v54 = vpop.eup %976 }
 0x137   :  { %v52_v55 = vmul.f32 %v977_v54, %v1090_v14  ;;  %v69_v59 = vadd.f32 %v780_v57, %v60_v56  ;;  %v960_v14 = vld [vmem:[%s1299_s5 + $0x20] sm:$0xff]  }
 0x139   :  { %v61_v58 = vmul.f32 %v779_v53, %v52_v55 }
 0x13b   :  { %v70_v60 = vadd.f32 %v780_v57, %v61_v58 }
 0x13d   :  { %v103_v63 = vpack.c.bf16 %v70_v60, %v69_v59 }
 0x13f   :  { %319 = vmatmul.mubr.bf16.vlgmr.msra.gmra.mrb[0].mxu0 %v103_v63  ;;  %362 = vmatmul.mubr.bf16.vlgmr.msra.gmra.mrb[0].mxu1 %v103_v63 }
 0x140   :  { %847 = vmatpush3.bf16.msra.mxu0 %v944_v61  ;;  %869 = vmatpush3.bf16.msra.mxu1 %v945_v62 }
 0x141   :  { %848 = vmatprep.subr.bf16.mxu0 %v946_v0  ;;  %870 = vmatprep.subr.bf16.mxu1 %v947_v1 }
 0x144   :  { %849 = vmatpush3.bf16.msra.mxu0 %v948_v2  ;;  %871 = vmatpush3.bf16.msra.mxu1 %v949_v3 }
 0x145   :  { %850 = vmatprep.subr.bf16.mxu0 %v950_v4  ;;  %872 = vmatprep.subr.bf16.mxu1 %v951_v5 }
 0x148   :  { %851 = vmatpush3.bf16.msra.mxu0 %v952_v6  ;;  %873 = vmatpush3.bf16.msra.mxu1 %v953_v7 }
 0x149   :  { %852 = vmatprep.subr.bf16.mxu0 %v954_v8  ;;  %874 = vmatprep.subr.bf16.mxu1 %v955_v9 }
 0x14c   :  { %853 = vmatpush3.bf16.msra.mxu0 %v956_v10  ;;  %875 = vmatpush3.bf16.msra.mxu1 %v957_v11 }
 0x14d   :  { %854 = vmatprep.subr.bf16.mxu0 %v958_v12  ;;  %876 = vmatprep.subr.bf16.mxu1 %v959_v13 }
 0x150   :  { %855 = vmatpush3.bf16.msra.mxu0 %v960_v14  ;;  %877 = vmatpush3.bf16.msra.mxu1 %v961_v15 }
 0x151   :  { %856 = vmatprep.subr.bf16.mxu0 %v962_v16  ;;  %878 = vmatprep.subr.bf16.mxu1 %v963_v17 }
 0x154   :  { %857 = vmatpush3.bf16.msra.mxu0 %v964_v18  ;;  %879 = vmatpush3.bf16.msra.mxu1 %v965_v19 }
 0x155   :  { %858 = vmatprep.subr.bf16.mxu0 %v966_v20  ;;  %880 = vmatprep.subr.bf16.mxu1 %v967_v21 }
 0x158   :  { %859 = vmatpush3.bf16.msra.mxu0 %v968_v22  ;;  %881 = vmatpush3.bf16.msra.mxu1 %v969_v23 }
 0x159   :  { %860 = vmatprep.subr.bf16.mxu0 %v970_v24  ;;  %882 = vmatprep.subr.bf16.mxu1 %v971_v25 }
 0x15c   :  { %861 = vmatpush3.bf16.msra.mxu0 %v972_v26  ;;  %883 = vmatpush3.bf16.msra.mxu1 %v973_v27 }
 0x212   :  { %v320_v39 = vpop.f32.mrb[0].mxu0  ;;  %v363_v40 = vpop.f32.mrb[0].mxu1 }
 0x213   :  { %v321_v41 = vadd.f32 %v320_v39, %v109_v35  ;;  %v364_v42 = vadd.f32 %v363_v40, %v117_v36  ;;  %v322_v43 = vpop.f32.mrb[1].mxu0  ;;  %v365_v44 = vpop.f32.mrb[1].mxu1 }
 0x214   :  { %v323_v45 = vadd.f32 %v322_v43, %v113_v37  ;;  %v366_v46 = vadd.f32 %v365_v44, %v121_v38  ;;  %v324_v47 = vpop.f32.mrb[2].mxu0  ;;  %v367_v48 = vpop.f32.mrb[2].mxu1 }
 0x215   :  { %v372_v49 = vmul.f32 0.5, %v321_v41  ;;  %v374_v50 = vmul.f32 0.5, %v364_v42  ;;  %v325_v51 = vadd.f32 %v324_v47, %v109_v35  ;;  %v368_v52 = vadd.f32 %v367_v48, %v117_v36  ;;  %v326_v53 = vpop.f32.mrb[3].mxu0  ;;  %v369_v54 = vpop.f32.mrb[3].mxu1 }
 0x216   :  { %v373_v55 = vmul.f32 0.5, %v323_v45  ;;  %v375_v56 = vmul.f32 0.5, %v366_v46  ;;  %v327_v57 = vadd.f32 %v326_v53, %v113_v37  ;;  %v370_v58 = vadd.f32 %v369_v54, %v121_v38  ;;  %v813_v37 = vld [vmem:[%s1300_s6] ss:$0 sm:$0xff]  ;;  %s994_s6 = scalar_lea.vmem %s769_s11, 256 }
 0x217   :  { %978 = vtanh.f32 %v372_v49  ;;  %v376_v59 = vmul.f32 0.5, %v325_v51  ;;  %v378_v60 = vmul.f32 0.5, %v368_v52  ;;  %p995_p0 = scmp.ne.s32.totalorder %s769_s11, %s994_s6  ;;  %p1000_p2 = scmp.lt.s32.totalorder %s994_s6, %s994_s6 }
 0x218   :  { %980 = vtanh.f32 %v374_v50  ;;  %v377_v61 = vmul.f32 0.5, %v327_v57  ;;  %v379_v62 = vmul.f32 0.5, %v370_v58 }
 0x219   :  { %982 = vtanh.f32 %v373_v55  ;;  %p1001_p3 = por %p1000_p2, %p999_p1 }
 0x21a   :  { %984 = vtanh.f32 %v375_v56 }
 0x21b   :  { %986 = vtanh.f32 %v376_v59  ;;  %p1002_p4 = pnand %p1001_p3, %p995_p0 }
 0x21c   :  { %988 = vtanh.f32 %v378_v60 }
 0x21d   :  { %990 = vtanh.f32 %v377_v61 }
 0x21e   :  { %992 = vtanh.f32 %v379_v62 }
 0x221   :  { %v979_v63 = vpop.eup %978 }
 0x222   :  { %v981_v0 = vpop.eup %980  ;;  %v388_v1 = vmul.f32 0.5, %v979_v63 }
 0x223   :  { %v983_v2 = vpop.eup %982  ;;  %v390_v3 = vmul.f32 0.5, %v981_v0 }
 0x224   :  { %v985_v4 = vpop.eup %984  ;;  %v389_v5 = vmul.f32 0.5, %v983_v2  ;;  %v396_v9 = vadd.f32 0.5, %v388_v1 }
 0x225   :  { %v987_v6 = vpop.eup %986  ;;  %v391_v7 = vmul.f32 0.5, %v985_v4  ;;  %v398_v12 = vadd.f32 0.5, %v390_v3 }
 0x226   :  { %v989_v8 = vpop.eup %988  ;;  %v392_v10 = vmul.f32 0.5, %v987_v6  ;;  %v397_v15 = vadd.f32 0.5, %v389_v5  ;;  %v404_v21 = vmul.f32 %v396_v9, %v321_v41 }
 0x227   :  { %v991_v11 = vpop.eup %990  ;;  %v394_v13 = vmul.f32 0.5, %v989_v8  ;;  %v399_v18 = vadd.f32 0.5, %v391_v7  ;;  %v406_v24 = vmul.f32 %v398_v12, %v364_v42 }
 0x228   :  { %v993_v14 = vpop.eup %992  ;;  %v400_v16 = vadd.f32 0.5, %v392_v10  ;;  %v393_v17 = vmul.f32 0.5, %v991_v11  ;;  %v405_v27 = vmul.f32 %v397_v15, %v323_v45 }
 0x229   :  { %v402_v19 = vadd.f32 0.5, %v394_v13  ;;  %v395_v20 = vmul.f32 0.5, %v993_v14  ;;  %v407_v30 = vmul.f32 %v399_v18, %v366_v46 }
 0x22a   :  { %v408_v22 = vmul.f32 %v400_v16, %v325_v51  ;;  %v401_v23 = vadd.f32 0.5, %v393_v17 }
 0x22b   :  { %v410_v25 = vmul.f32 %v402_v19, %v368_v52  ;;  %v403_v26 = vadd.f32 0.5, %v395_v20 }
 0x22c   :  { %v476_v28 = vpack.c.bf16 %v408_v22, %v404_v21  ;;  %v409_v29 = vmul.f32 %v401_v23, %v327_v57 }
 0x22d   :  { %v478_v31 = vpack.c.bf16 %v410_v25, %v406_v24  ;;  %v411_v32 = vmul.f32 %v403_v26, %v370_v58 }
 0x22e   :  { %v477_v33 = vpack.c.bf16 %v409_v29, %v405_v27 }
 0x22f   :  { %v479_v34 = vpack.c.bf16 %v411_v32, %v407_v30 }
 0x230   :  { %711 = vmatprep.mubr.bf16.mxu0 %v477_v33 }
 0x231   :  { %752 = vmatprep.mubr.bf16.mxu1 %v479_v34  ;;  %712 = vmatmul.mubr.bf16.vlgmr.msra.gmra.mrb[4].mxu0 %v476_v28 }
 0x232   :  { %753 = vmatmul.mubr.bf16.vlgmr.msra.gmra.mrb[4].mxu1 %v478_v31 }
 0x304   :  { %v862_v35 = vpop.f32.mrb[4].mxu0 }
 0x305   :  { %v884_v36 = vpop.f32.mrb[4].mxu1  ;;  %v863_v38 = vpop.f32.mrb[5].mxu0 }
 0x306   :  { %v864_v39 = vadd.f32 %v863_v38, %v862_v35  ;;  %v885_v40 = vpop.f32.mrb[5].mxu1  ;;  %v865_v41 = vpop.f32.mrb[6].mxu0 }
 0x307   :  { %v886_v42 = vadd.f32 %v885_v40, %v884_v36  ;;  %v887_v43 = vpop.f32.mrb[6].mxu1  ;;  %v866_v44 = vpop.f32.mrb[7].mxu0 }
 0x308   :  { %v714_v45 = vadd.f32 %v864_v39, %v813_v37  ;;  %v867_v46 = vadd.f32 %v866_v44, %v865_v41  ;;  %v888_v47 = vpop.f32.mrb[7].mxu1 }
 0x309   :  { %v889_v48 = vadd.f32 %v888_v47, %v887_v43 }
 0x30a   :  { %v755_v49 = vadd.f32 %v886_v42, %v714_v45  ;;  %v717_v50 = vadd.f32 %v867_v46, %v813_v37 }
 0x30c   :  { %761 = vst [vmem:[#allocation2] sm:$0xff] %v755_v49  ;;  %v758_v51 = vadd.f32 %v889_v48, %v717_v50 }
 0x30e   :  { %762 = vst [vmem:[#allocation2 + $0x8] sm:$0xff] %v758_v51 }
 0x30f   :  { %1005 = shalt.err (!%p1002_p4)
}
 0x310   :  { %s1006_s0 = scalar_lea.hbm %s1301_s7, 256 }
 0x311   :  { %p1007_p5 = scmp.ne.s32.totalorder %s1301_s7, %s1006_s0  ;;  %p1010_p6 = scmp.lt.u32.totalorder %s1006_s0, %s1301_s7 }
 0x313   :  { %p1012_p7 = pnand %p1010_p6, %p1007_p5 }
 0x315   :  { %1015 = shalt.err (!%p1012_p7)
}
 0x316   :  { %s1020_s18 = smov 128   ;;  %s1021_s19 = smov 8  }
 0x317   :  { %774 = dma.vmem_to_hbm [thread:$0]  %s769_s11, 256, %s1301_s7, [#allocation3], %s1020_s18, %s1020_s18, %s1021_s19  }
 0x318   :  { %1016 = dma.done.wait [#allocation3], 256  }
 0x319   :  { %1017 = vsyncadd [#allocation3], 4294967040 }
 0x31a   :  { %778 = vsyncpa [#allocation3], 1 }

</bundles_post_ra>
